<compile_context>
chip_gen: v6e
topology: v6e:2x2x1
jax: 0.10.0
libtpu: 0.0.40
codegen_flags: <defaults>
</compile_context>

<pallas_src>
import jax
import jax.numpy as jnp
from jax.experimental import pallas as pl
from jax.experimental.pallas import tpu as pltpu


def _scale_mul_kernel(x_ref, s_ref, o_ref):
    # x_ref: (block_rows, W)   s_ref: (1, W)   o_ref: (block_rows, W)
    # Single fused elementwise multiply (all four layer multiplies folded
    # into the resident scale).
    o_ref[...] = x_ref[...] * s_ref[...]


def tensor_list_forward(x, layers, *, block_rows=None, force_kernel=False):
    """Pallas TPU implementation of TensorList.forward.

    x: [..., 10, 10] float32.  layers: ((1,10), (10,1), (1,10), (10,1)).
    """
    a, b, c, d = layers
    R = b.shape[0]          # 10 (second-to-last dim of x, from the (10,1) layers)
    C = a.shape[1]          # 10 (last dim of x, from the (1,10) layers)
    assert x.shape[-2:] == (R, C), "x must broadcast against (1,10) and (10,1)"
    orig_shape = x.shape

    # Fold the four broadcast multipliers into one (R, C) combined scale.
    # (FP reassociation of pure multiplies differs by at most a few ulps.)
    scale = ((a * c) * (b * d)).astype(x.dtype)            # (R, C)

    itemsize = jnp.dtype(x.dtype).itemsize
    total_bytes = x.size * itemsize
    if not force_kernel and total_bytes < (256 << 10):
        # Tiny inputs: pallas_call fixed overhead dominates; XLA fuses the
        # single multiply into one pass anyway.
        return x * scale

    B = x.size // (R * C)
    x2 = x.reshape(B, R * C)                               # dense, no pad bytes
    s2 = scale.reshape(1, R * C)

    # Group batch items so the lane (last) dim is a multiple of 128:
    # 32 * 100 = 3200 = 25 * 128 -> unmasked, lane-dense vst/vld.
    GROUP = 32
    if B % GROUP == 0:
        rows, width = B // GROUP, GROUP * R * C
        xk = x2.reshape(rows, width)
        sk = jnp.tile(s2, (1, GROUP))                      # (1, 3200), tiny
    else:
        rows, width = B, R * C                             # last dim == full dim
        xk = x2
        sk = s2

    row_bytes = width * itemsize
    if block_rows is None:
        # ~2 MiB per block => double-buffered in+out stays well under the
        # scoped-VMEM defaults on every generation, while each grid step
        # still moves plenty of bytes to amortize the ~0.35 us/step overhead.
        target = 2 << 20
        block_rows = max(8, (target // row_bytes) // 8 * 8)
    if rows * row_bytes <= (2 << 20) or block_rows >= rows:
        block_rows = rows                                  # single full block
    grid_rows = pl.cdiv(rows, block_rows)

    x_spec_kwargs = {}
    if grid_rows > 2:
        # Deeper input buffering hides exposed DMA latency for this pure
        # streaming kernel (one vmul per vreg of compute).
        x_spec_kwargs["pipeline_mode"] = pl.Buffered(3)

    cost = pl.CostEstimate(
        flops=rows * width,
        transcendentals=0,
        bytes_accessed=2 * rows * row_bytes + width * itemsize,
    )

    out = pl.pallas_call(
        _scale_mul_kernel,
        out_shape=jax.ShapeDtypeStruct((rows, width), x.dtype),
        grid=(grid_rows,),
        in_specs=[
            pl.BlockSpec((block_rows, width), lambda i: (i, 0), **x_spec_kwargs),
            pl.BlockSpec((1, width), lambda i: (0, 0)),    # scale stays resident
        ],
        out_specs=pl.BlockSpec((block_rows, width), lambda i: (i, 0)),
        compiler_params=pltpu.CompilerParams(
            dimension_semantics=("parallel",)),
        cost_estimate=cost,
    )(xk, sk)

    return out.reshape(orig_shape)


if __name__ == "__main__":
    key = jax.random.PRNGKey(0)
    k_x, k_a, k_b, k_c, k_d = jax.random.split(key, 5)

    # Small shapes consistent with the module: x is [batch, 10, 10].
    B, R, C = 2, 10, 10
    x = jax.random.normal(k_x, (B, R, C), dtype=jnp.float32)

    # Deterministic "parameters" matching the torch.randn shapes in __init__.
    layers = (
        jax.random.normal(k_a, (1, 10), dtype=jnp.float32),
        jax.random.normal(k_b, (10, 1), dtype=jnp.float32),
        jax.random.normal(k_c, (1, 10), dtype=jnp.float32),
        jax.random.normal(k_d, (10, 1), dtype=jnp.float32),
    )

    out = tensor_list_forward(x, layers, force_kernel=True)
    out = jax.block_until_ready(out)

    # Reference: the original sequential broadcast multiplies.
    ref = x
    for layer in layers:
        ref = ref * layer
    assert out.shape == ref.shape, "shape mismatch vs reference"
    assert jnp.allclose(out, ref, atol=1e-5, rtol=1e-5), "mismatch vs reference"

    print("KERNEL_OK")
</pallas_src>

<mosaic_0001>
module attributes {stable_mosaic.version = 11 : i64} {
  func.func @_scale_mul_kernel(%arg0: i32, %arg1: memref<2x100xf32, #tpu.memory_space<vmem>>, %arg2: memref<1x100xf32, #tpu.memory_space<vmem>>, %arg3: memref<2x100xf32, #tpu.memory_space<vmem>>) attributes {dimension_semantics = [#tpu.dimension_semantics<parallel>], iteration_bounds = array<i64: 1>, scalar_prefetch = 0 : i64, scratch_operands = 0 : i64, tpu.core_type = #tpu.core_type<tc>, window_params = [{transform_indices = @transform_0, window_bounds = array<i64: 2, 100>}, {pipeline_mode = #tpu.pipeline_mode<synchronous>, transform_indices = @transform_1, window_bounds = array<i64: 1, 100>}, {transform_indices = @transform_2, window_bounds = array<i64: 2, 100>}]} {
    %c0 = arith.constant 0 : index
    %c0_0 = arith.constant 0 : index
    %0 = vector.load %arg1[%c0, %c0_0] : memref<2x100xf32, #tpu.memory_space<vmem>>, vector<2x100xf32>
    %c0_1 = arith.constant 0 : index
    %c0_2 = arith.constant 0 : index
    %1 = vector.load %arg2[%c0_1, %c0_2] : memref<1x100xf32, #tpu.memory_space<vmem>>, vector<1x100xf32>
    %2 = vector.broadcast %1 : vector<1x100xf32> to vector<2x100xf32>
    %3 = arith.mulf %0, %2 : vector<2x100xf32>
    %c0_3 = arith.constant 0 : index
    %c0_4 = arith.constant 0 : index
    %4 = vector.load %arg3[%c0_3, %c0_4] : memref<2x100xf32, #tpu.memory_space<vmem>>, vector<2x100xf32>
    tpu.vector_store %arg3[%c0_3, %c0_4], %3 {strides = array<i32>} : memref<2x100xf32, #tpu.memory_space<vmem>>, vector<2x100xf32>,
    return
  }
  func.func @transform_0(%arg0: i32) -> (i32, i32) {
    %c0_i32 = arith.constant 0 : i32
    %c0_i32_0 = arith.constant 0 : i32
    return %arg0, %c0_i32 : i32, i32
  }
  func.func @transform_1(%arg0: i32) -> (i32, i32) {
    %c0_i32 = arith.constant 0 : i32
    %c0_i32_0 = arith.constant 0 : i32
    %c0_i32_1 = arith.constant 0 : i32
    return %c0_i32, %c0_i32_0 : i32, i32
  }
  func.func @transform_2(%arg0: i32) -> (i32, i32) {
    %c0_i32 = arith.constant 0 : i32
    %c0_i32_0 = arith.constant 0 : i32
    return %arg0, %c0_i32 : i32, i32
  }
}

</mosaic_0001>

<bundles_post_ra>
// kernel: tpu_custom_call.1
= control target key start
LH: loop header
LB: loop body
LE: loop exit
PB: predicated region body
PF: predicated region fallthrough
CT: control target
= control target key end

     0   :  { %7 = vsyncpa [#allocation3], 0  ;;  %s123_s0 = inlined_call_operand.hbm [shape: f32[2,100], index: 0, kind: input, shape index: {}]   ;;  %s124_s1 = inlined_call_operand.vmem [shape: f32[1,100], index: 1, kind: input, shape index: {}]   ;;  %s125_s2 = inlined_call_operand.hbm [shape: f32[2,100], index: 2, kind: output, shape index: {}]  }
   0x1   :  { %8 = vsyncpa [#allocation4], 0  ;;  %s97_s9 = smov [#allocation2]  }
   0x2   :  { %s15_s10 = sshll.u32 %s97_s9, 4  ;;  %s16_s10 = int_to_ptr.vmem [resolvable:$true] %s15_s10 }
   0x3   :  { %s61_s11 = scalar_lea.vmem %s16_s10, 32  ;;  %p66_p1 = scmp.lt.s32.totalorder %s16_s10, %s16_s10 }
   0x4   :  { %p62_p0 = scmp.ne.s32.totalorder %s16_s10, %s61_s11  ;;  %p67_p2 = scmp.lt.s32.totalorder %s61_s11, %s61_s11 }
   0x6   :  { %p68_p3 = por %p67_p2, %p66_p1 }
   0x8   :  { %p69_p4 = pnand %p68_p3, %p62_p0 }
   0xa   :  { %72 = shalt.err (!%p69_p4)
}
   0xb   :  { %18 = dma.hbm_to_vmem [thread:$0]  %s123_s0, 32, %s16_s10, [#allocation3]  }
   0xc   :  { %93 = dma.done.wait [#allocation3], 32  }
   0xd   :  { %94 = vsyncadd [#allocation3], 4294967264  ;;  %s98_s14 = smov [#allocation5]   ;;  %v24_v0 = vld [vmem:[#allocation2] sm:$0x3]  ;;  %vm33_vm0 = vcmask 812032  }
   0xe   :  { %s41_s15 = sshll.u32 %s98_s14, 4  ;;  %v50_v1 = vld [vmem:[%s124_s1] ss:$0 sm:$0xff]  ;;  %s42_s15 = int_to_ptr.vmem [resolvable:$true] %s41_s15 }
   0xf   :  { %v32_v2 = vmul.f32 %v50_v1, %v24_v0  ;;  %s73_s18 = scalar_lea.vmem %s42_s15, 32  ;;  %p78_p6 = scmp.lt.s32.totalorder %s42_s15, %s42_s15 }
  0x10   :  { %p74_p5 = scmp.ne.s32.totalorder %s42_s15, %s73_s18  ;;  %p79_p7 = scmp.lt.s32.totalorder %s73_s18, %s73_s18 }
  0x11   :  { %34 = vst.msk [vmem:[#allocation5] sm:$0x3] %vm33_vm0, %v32_v2 }
  0x12   :  { %p80_p8 = por %p79_p7, %p78_p6 }
  0x14   :  { %p81_p9 = pnand %p80_p8, %p74_p5 }
  0x16   :  { %84 = shalt.err (!%p81_p9)
}
  0x17   :  { %44 = dma.vmem_to_hbm [thread:$0]  %s42_s15, 32, %s125_s2, [#allocation4]  }
  0x18   :  { %95 = dma.done.wait [#allocation4], 32  }
  0x19   :  { %96 = vsyncadd [#allocation4], 4294967264 }
  0x1a   :  { %48 = vsyncpa [#allocation3], 1 }
  0x1b   :  { %49 = vsyncpa [#allocation4], 1 }

</bundles_post_ra>
